<compile_context>
chip_gen: v7x
topology: tpu7x:2x2x1
jax: 0.10.0
libtpu: 0.0.40
codegen_flags: <defaults>
</compile_context>

<pallas_src>
import functools

import jax
import jax.numpy as jnp
from jax.experimental import pallas as pl
from jax.experimental.pallas import tpu as pltpu


# ---------------------------------------------------------------------------
# Kernel
# ---------------------------------------------------------------------------
def _gru_fused_kernel(x_ref, h_ref, w_ref, b_ref, out_ref):
    """Fused GRUCell step for one batch tile.

    x_ref  : (TB, K)   K = m_dim + H (message path) or H (blank-message path)
    h_ref  : (TB, H)   previous hidden state
    w_ref  : (K, 4H)   fused weights, columns = [r | z | i_n | h_n]
    b_ref  : (1, 4H)   fused biases   [b_ir+b_hr | b_iz+b_hz | b_in | b_hn]
    out_ref: (TB, H)   new hidden state
    """
    x = x_ref[...].astype(jnp.float32)
    h = h_ref[...].astype(jnp.float32)

    # Single MXU pass: (TB, K) @ (K, 4H) -> all gate pre-activations at once.
    g = jnp.dot(x, w_ref[...], preferred_element_type=jnp.float32) + b_ref[...]

    H = h_ref.shape[-1]
    r = jax.nn.sigmoid(g[:, 0:H])
    z = jax.nn.sigmoid(g[:, H:2 * H])
    i_n = g[:, 2 * H:3 * H]          # already includes b_in
    h_n = g[:, 3 * H:4 * H]          # already includes b_hn
    n = jnp.tanh(i_n + r * h_n)      # torch.nn.GRUCell semantics

    out_ref[...] = ((1.0 - z) * n + z * h).astype(out_ref.dtype)


# ---------------------------------------------------------------------------
# pallas_call wrapper
# ---------------------------------------------------------------------------
def _pick_tile_b(B):
    """Batch tile: full batch when small, otherwise a multiple-of-8 divisor."""
    if B <= 512:
        return B
    for t in (512, 256, 128, 64, 32, 16, 8):
        if B % t == 0:
            return t
    return B


def _gru_pallas_step(x, h, w_full, b_full):
    B, H = h.shape
    K = x.shape[-1]
    Hg = b_full.shape[-1]            # 4*H
    tile_b = _pick_tile_b(B)
    grid = (pl.cdiv(B, tile_b),)

    cost = pl.CostEstimate(
        flops=2 * B * K * Hg + 10 * B * H,
        transcendentals=3 * B * H,
        bytes_accessed=4 * (B * K + 2 * B * H + K * Hg + Hg),
    )

    return pl.pallas_call(
        _gru_fused_kernel,
        out_shape=jax.ShapeDtypeStruct((B, H), h.dtype),
        grid_spec=pltpu.PrefetchScalarGridSpec(
            num_scalar_prefetch=0,
            grid=grid,
            in_specs=[
                pl.BlockSpec((tile_b, K), lambda i: (i, 0)),   # x  (batch-tiled)
                pl.BlockSpec((tile_b, H), lambda i: (i, 0)),   # h  (batch-tiled)
                pl.BlockSpec((K, Hg), lambda i: (0, 0)),       # fused W (resident)
                pl.BlockSpec((1, Hg), lambda i: (0, 0)),       # fused b (resident)
            ],
            out_specs=pl.BlockSpec((tile_b, H), lambda i: (i, 0)),
        ),
        compiler_params=pltpu.CompilerParams(
            dimension_semantics=("parallel",),       # megacore-shardable on v7x
            vmem_limit_bytes=32 * 1024 * 1024,       # fits v7x's 64 MiB budget
        ),
        cost_estimate=cost,
    )(x, h, w_full, b_full)


@jax.jit
def gru_step_message(m, h, w_full, b_full):
    """use_message=True path: one fused matmul on [m | h]."""
    x = jnp.concatenate([m, h], axis=-1)
    return _gru_pallas_step(x, h, w_full, b_full)


@jax.jit
def gru_step_blank(h, w_h_only, b_full):
    """use_message=False path: m == 0, so skip the message matmul / W_ih DMA."""
    return _gru_pallas_step(h, h, w_h_only, b_full)


# ---------------------------------------------------------------------------
# Module port
# ---------------------------------------------------------------------------
class MessageProcessorPallas:
    """JAX/Pallas port of MessageProcessor (GRUCell on message + hidden)."""

    def __init__(self, m_dim, hid_dim, key):
        self.m_dim = m_dim
        self.hid_dim = hid_dim
        k1, k2 = jax.random.split(key)

        def xavier_normal(k, shape):
            fan_out, fan_in = shape
            std = jnp.sqrt(2.0 / (fan_in + fan_out))
            return std * jax.random.normal(k, shape, dtype=jnp.float32)

        H = hid_dim
        # nn.GRUCell parameters (reset_parameters_util: xavier_normal weights,
        # zero biases). Gate order (r, z, n), matching torch.
        self.w_ih = xavier_normal(k1, (3 * H, m_dim))
        self.w_hh = xavier_normal(k2, (3 * H, H))
        self.b_ih = jnp.zeros((3 * H,), dtype=jnp.float32)
        self.b_hh = jnp.zeros((3 * H,), dtype=jnp.float32)

        # --- pre-fused kernel layouts (computed once, no per-call transposes) ---
        wih_t = self.w_ih.T                       # (m_dim, 3H)
        whh_t = self.w_hh.T                       # (H, 3H)
        top = jnp.concatenate(                    # message rows: [r | z | i_n | 0]
            [wih_t[:, :2 * H], wih_t[:, 2 * H:], jnp.zeros((m_dim, H), jnp.float32)],
            axis=1)
        bot = jnp.concatenate(                    # hidden rows:  [r | z | 0 | h_n]
            [whh_t[:, :2 * H], jnp.zeros((H, H), jnp.float32), whh_t[:, 2 * H:]],
            axis=1)
        self.w_full = jnp.concatenate([top, bot], axis=0)   # (m_dim + H, 4H)
        self.w_h_only = bot                                  # (H, 4H)  blank-msg path
        self.b_full = jnp.concatenate(                       # (1, 4H)
            [self.b_ih[:2 * H] + self.b_hh[:2 * H],
             self.b_ih[2 * H:], self.b_hh[2 * H:]]).reshape(1, 4 * H)

    def __call__(self, m, h, use_message):
        if use_message:
            return gru_step_message(m, h, self.w_full, self.b_full)
        # "Ignoring message, using blank instead..." — m == 0, drop its matmul.
        return gru_step_blank(h, self.w_h_only, self.b_full)


# ---------------------------------------------------------------------------
# Pure-JAX reference (torch.nn.GRUCell semantics) and self-test
# ---------------------------------------------------------------------------
def _gru_cell_ref(m, h, w_ih, w_hh, b_ih, b_hh):
    gi = m @ w_ih.T + b_ih
    gh = h @ w_hh.T + b_hh
    H = h.shape[-1]
    i_r, i_z, i_n = gi[:, :H], gi[:, H:2 * H], gi[:, 2 * H:]
    h_r, h_z, h_n = gh[:, :H], gh[:, H:2 * H], gh[:, 2 * H:]
    r = jax.nn.sigmoid(i_r + h_r)
    z = jax.nn.sigmoid(i_z + h_z)
    n = jnp.tanh(i_n + r * h_n)
    return (1.0 - z) * n + z * h


if __name__ == "__main__":
    B, M_DIM, HID_DIM = 8, 16, 32

    key = jax.random.PRNGKey(0)
    k_params, k_m, k_h = jax.random.split(key, 3)

    proc = MessageProcessorPallas(M_DIM, HID_DIM, k_params)

    m = jax.random.normal(k_m, (B, M_DIM), dtype=jnp.float32)
    h = jax.random.normal(k_h, (B, HID_DIM), dtype=jnp.float32)

    # use_message = True path
    out_msg = jax.block_until_ready(proc(m, h, use_message=True))
    ref_msg = _gru_cell_ref(m, h, proc.w_ih, proc.w_hh, proc.b_ih, proc.b_hh)

    # use_message = False path (blank message)
    out_blank = jax.block_until_ready(proc(m, h, use_message=False))
    ref_blank = _gru_cell_ref(jnp.zeros_like(m), h, proc.w_ih, proc.w_hh,
                              proc.b_ih, proc.b_hh)

    assert out_msg.shape == (B, HID_DIM)
    assert jnp.allclose(out_msg, ref_msg, atol=1e-5, rtol=1e-5)
    assert jnp.allclose(out_blank, ref_blank, atol=1e-5, rtol=1e-5)

    print("KERNEL_OK")
</pallas_src>

<mosaic_0001>
module attributes {stable_mosaic.version = 11 : i64} {
  func.func @_gru_fused_kernel(%arg0: i32, %arg1: memref<8x48xf32, #tpu.memory_space<vmem>>, %arg2: memref<8x32xf32, #tpu.memory_space<vmem>>, %arg3: memref<48x128xf32, #tpu.memory_space<vmem>>, %arg4: memref<1x128xf32, #tpu.memory_space<vmem>>, %arg5: memref<8x32xf32, #tpu.memory_space<vmem>>) attributes {dimension_semantics = [#tpu.dimension_semantics<parallel>], iteration_bounds = array<i64: 1>, scalar_prefetch = 0 : i64, scratch_operands = 0 : i64, tpu.core_type = #tpu.core_type<tc>, window_params = [{transform_indices = @transform_0, window_bounds = array<i64: 8, 48>}, {transform_indices = @transform_1, window_bounds = array<i64: 8, 32>}, {pipeline_mode = #tpu.pipeline_mode<synchronous>, transform_indices = @transform_2, window_bounds = array<i64: 48, 128>}, {pipeline_mode = #tpu.pipeline_mode<synchronous>, transform_indices = @transform_3, window_bounds = array<i64: 1, 128>}, {transform_indices = @transform_4, window_bounds = array<i64: 8, 32>}]} {
    %c0 = arith.constant 0 : index
    %c0_0 = arith.constant 0 : index
    %0 = vector.load %arg1[%c0, %c0_0] : memref<8x48xf32, #tpu.memory_space<vmem>>, vector<8x48xf32>
    %c0_1 = arith.constant 0 : index
    %c0_2 = arith.constant 0 : index
    %1 = vector.load %arg2[%c0_1, %c0_2] : memref<8x32xf32, #tpu.memory_space<vmem>>, vector<8x32xf32>
    %c0_3 = arith.constant 0 : index
    %c0_4 = arith.constant 0 : index
    %2 = vector.load %arg3[%c0_3, %c0_4] : memref<48x128xf32, #tpu.memory_space<vmem>>, vector<48x128xf32>
    %cst = arith.constant dense<0.000000e+00> : vector<8x128xf32>
    %3 = tpu.matmul %0, %2, %cst {dimension_numbers = #tpu.dot_dimension_numbers<[1], [0], [0], [1], [0, 0, 1, 1], [], []>} : vector<8x48xf32>, vector<48x128xf32>, vector<8x128xf32> -> vector<8x128xf32>
    %c0_5 = arith.constant 0 : index
    %c0_6 = arith.constant 0 : index
    %4 = vector.load %arg4[%c0_5, %c0_6] : memref<1x128xf32, #tpu.memory_space<vmem>>, vector<1x128xf32>
    %5 = vector.broadcast %4 : vector<1x128xf32> to vector<8x128xf32>
    %6 = arith.addf %3, %5 : vector<8x128xf32>
    %7 = vector.extract_strided_slice %6 {offsets = [0, 0], sizes = [8, 32], strides = [1, 1]} : vector<8x128xf32> to vector<8x32xf32>
    %8 = arith.negf %7 : vector<8x32xf32>
    %9 = math.exp %8 : vector<8x32xf32>
    %cst_7 = arith.constant 1.000000e+00 : f32
    %10 = vector.broadcast %cst_7 : f32 to vector<8x32xf32>
    %11 = arith.addf %10, %9 : vector<8x32xf32>
    %12 = arith.divf %10, %11 : vector<8x32xf32>
    %13 = vector.extract_strided_slice %6 {offsets = [0, 32], sizes = [8, 32], strides = [1, 1]} : vector<8x128xf32> to vector<8x32xf32>
    %14 = arith.negf %13 : vector<8x32xf32>
    %15 = math.exp %14 : vector<8x32xf32>
    %cst_8 = arith.constant 1.000000e+00 : f32
    %16 = vector.broadcast %cst_8 : f32 to vector<8x32xf32>
    %17 = arith.addf %16, %15 : vector<8x32xf32>
    %18 = arith.divf %16, %17 : vector<8x32xf32>
    %19 = vector.extract_strided_slice %6 {offsets = [0, 64], sizes = [8, 32], strides = [1, 1]} : vector<8x128xf32> to vector<8x32xf32>
    %20 = vector.extract_strided_slice %6 {offsets = [0, 96], sizes = [8, 32], strides = [1, 1]} : vector<8x128xf32> to vector<8x32xf32>
    %21 = arith.mulf %12, %20 : vector<8x32xf32>
    %22 = arith.addf %19, %21 : vector<8x32xf32>
    %23 = math.tanh %22 : vector<8x32xf32>
    %cst_9 = arith.constant 1.000000e+00 : f32
    %24 = vector.broadcast %cst_9 : f32 to vector<8x32xf32>
    %25 = arith.subf %24, %18 : vector<8x32xf32>
    %26 = arith.mulf %25, %23 : vector<8x32xf32>
    %27 = arith.mulf %18, %1 : vector<8x32xf32>
    %28 = arith.addf %26, %27 : vector<8x32xf32>
    %c0_10 = arith.constant 0 : index
    %c0_11 = arith.constant 0 : index
    %29 = vector.load %arg5[%c0_10, %c0_11] : memref<8x32xf32, #tpu.memory_space<vmem>>, vector<8x32xf32>
    tpu.vector_store %arg5[%c0_10, %c0_11], %28 {strides = array<i32>} : memref<8x32xf32, #tpu.memory_space<vmem>>, vector<8x32xf32>,
    return
  }
  func.func @transform_0(%arg0: i32) -> (i32, i32) {
    %c0_i32 = arith.constant 0 : i32
    %c0_i32_0 = arith.constant 0 : i32
    return %arg0, %c0_i32 : i32, i32
  }
  func.func @transform_1(%arg0: i32) -> (i32, i32) {
    %c0_i32 = arith.constant 0 : i32
    %c0_i32_0 = arith.constant 0 : i32
    return %arg0, %c0_i32 : i32, i32
  }
  func.func @transform_2(%arg0: i32) -> (i32, i32) {
    %c0_i32 = arith.constant 0 : i32
    %c0_i32_0 = arith.constant 0 : i32
    %c0_i32_1 = arith.constant 0 : i32
    return %c0_i32, %c0_i32_0 : i32, i32
  }
  func.func @transform_3(%arg0: i32) -> (i32, i32) {
    %c0_i32 = arith.constant 0 : i32
    %c0_i32_0 = arith.constant 0 : i32
    %c0_i32_1 = arith.constant 0 : i32
    return %c0_i32, %c0_i32_0 : i32, i32
  }
  func.func @transform_4(%arg0: i32) -> (i32, i32) {
    %c0_i32 = arith.constant 0 : i32
    %c0_i32_0 = arith.constant 0 : i32
    return %arg0, %c0_i32 : i32, i32
  }
}

</mosaic_0001>

<bundles_post_ra>
// kernel: gru_step_message.1
= control target key start
LH: loop header
LB: loop body
LE: loop exit
PB: predicated region body
PF: predicated region fallthrough
CT: control target
= control target key end

     0   :  { %9 = vsyncpa [#allocation3], 0  ;;  %s337_s0 = inlined_call_operand.vmem [shape: f32[8,48], index: 0, kind: input, shape index: {}]   ;;  %s338_s1 = inlined_call_operand.vmem [shape: f32[8,32], index: 1, kind: input, shape index: {}]   ;;  %s339_s2 = inlined_call_operand.hbm [shape: f32[48,128], index: 2, kind: input, shape index: {}]   ;;  %s340_s3 = inlined_call_operand.vmem [shape: f32[1,128], index: 3, kind: input, shape index: {}]   ;;  %s341_s4 = inlined_call_operand.hbm [shape: f32[8,32], index: 4, kind: output, shape index: {}]  }
   0x1   :  { %10 = vsyncpa [#allocation4], 0  ;;  %s269_s15 = smov [#allocation2]   ;;  %s221_s19 = scalar_lea.hbm %s339_s2, 768 }
   0x2   :  { %s20_s16 = sshll.u32 %s269_s15, 4  ;;  %p222_p0 = scmp.ne.s32.totalorder %s339_s2, %s221_s19  ;;  %s21_s16 = int_to_ptr.vmem [resolvable:$true] %s20_s16 }
   0x3   :  { %p225_p1 = scmp.lt.u32.totalorder %s221_s19, %s339_s2 }
   0x5   :  { %p227_p2 = pnand %p225_p1, %p222_p0 }
   0x7   :  { %230 = shalt.err (!%p227_p2)
}
   0x8   :  { %s231_s24 = scalar_lea.vmem %s21_s16, 768  ;;  %p236_p4 = scmp.lt.s32.totalorder %s21_s16, %s21_s16 }
   0x9   :  { %p232_p3 = scmp.ne.s32.totalorder %s21_s16, %s231_s24  ;;  %p237_p5 = scmp.lt.s32.totalorder %s231_s24, %s231_s24 }
   0xb   :  { %p238_p6 = por %p237_p5, %p236_p4 }
   0xd   :  { %p239_p7 = pnand %p238_p6, %p232_p3 }
   0xf   :  { %242 = shalt.err (!%p239_p7)
}
  0x10   :  { %s270_s25 = smov 128   ;;  %s271_s26 = smov 8  }
  0x11   :  { %26 = dma.hbm_to_vmem [thread:$0]  %s339_s2, 768, %s21_s16, [#allocation3], %s270_s25, %s270_s25, %s271_s26  }
  0x12   :  { %265 = dma.done.wait [#allocation3], 768  }
  0x13   :  { %266 = vsyncadd [#allocation3], 4294966528  ;;  %v272_v0 = vmov 0.0|0.0   ;;  %vm273_vm0 = vmmov 0   ;;  %v274_v1 = vmov 0.0   ;;  %v34_v2 = vld [vmem:[#allocation2] sm:$0xff] }
  0x14   :  { %196 = vmatprep.subr.bf16.mxu0 %v272_v0  ;;  %193 = vmatprep.mubr.msk.f32.mxu0 %vm273_vm0, %v274_v1  ;;  %v35_v3 = vld [vmem:[#allocation2 + $0x8] sm:$0xff]  ;;  %v36_v4 = vld [vmem:[#allocation2 + $0x10] sm:$0xff]  ;;  %v37_v6 = vld [vmem:[#allocation2 + $0x18] sm:$0xff]  ;;  %vm47_vm1 = vcmask 392192   ;;  %s275_s6 = smov 32   ;;  %s278_s9 = smov [#allocation5]  }
  0x15   :  { %v197_v5 = vpack.c.bf16 %v35_v3, %v34_v2  ;;  %v200_v7 = vpack.c.bf16 %v37_v6, %v36_v4  ;;  %v38_v8 = vld [vmem:[#allocation2 + $0x20] sm:$0xff]  ;;  %v39_v9 = vld [vmem:[#allocation2 + $0x28] sm:$0xff]  ;;  %v32_v11 = vld [vmem:[%s337_s0] sm:$0xff]  ;;  %s276_s0 = smov 64   ;;  %s162_s10 = sshll.u32 %s278_s9, 4  ;;  %vm154_vm2 = vcmask 261120   ;;  %s163_s10 = int_to_ptr.vmem [resolvable:$true] %s162_s10 }
  0x16   :  { %v203_v10 = vpack.c.bf16 %v39_v9, %v38_v8  ;;  %v171_v12 = vld [vmem:[%s340_s3] ss:$0 sm:$0xff]  ;;  %s277_s3 = smov 96   ;;  %s243_s11 = scalar_lea.vmem %s163_s10, 128 }
  0x17   :  { %198 = vmatpush3.bf16.msra.mxu0 %v197_v5  ;;  %v33_v25 = vld [vmem:[%s338_s1] sm:$0xff]  ;;  %p244_p8 = scmp.ne.s32.totalorder %s163_s10, %s243_s11  ;;  %p248_p9 = scmp.lt.s32.totalorder %s163_s10, %s163_s10 }
  0x18   :  { %199 = vmatprep.subr.bf16.mxu0 %v272_v0  ;;  %p249_p10 = scmp.lt.s32.totalorder %s243_s11, %s243_s11 }
  0x1a   :  { %p250_p11 = por %p249_p10, %p248_p9 }
  0x1b   :  { %201 = vmatpush3.bf16.msra.mxu0 %v200_v7 }
  0x1c   :  { %202 = vmatprep.subr.bf16.mxu0 %v272_v0  ;;  %p251_p12 = pnand %p250_p11, %p244_p8 }
  0x1f   :  { %204 = vmatpush3.bf16.msra.mxu0 %v203_v10 }
  0x22   :  { %194 = vmatmul.mubr.msk.f32.vlgmr.msra.gmra.mrb[0].mxu0 %vm47_vm1, %v32_v11 }
  0xf5   :  { %v117_v13 = vpop.f32.mrb[0].mxu0 }
  0xf6   :  { %v118_v14 = vadd.f32 %v171_v12, %v117_v13  ;;  %v195_v15 = vpop.f32.mrb[1].mxu0 }
  0xf8   :  { %128 = vrot.lane.b32.xlu0 %v118_v14, %s275_s6  ;;  %v173_v16 = vmul.f32 -1.442695, %v118_v14 }
  0xfa   :  { %215 = vpow2.f32 %v173_v16 }
 0x104   :  { %v216_v17 = vpop.eup %215 }
 0x105   :  { %v124_v18 = vadd.f32 1.0, %v216_v17 }
 0x107   :  { %217 = vrcp.f32 %v124_v18 }
 0x111   :  { %v218_v19 = vpop.eup %217 }
 0x112   :  { %v138_v27 = vsub.f32 1.0, %v218_v19 }
 0x16a   :  { %v129_v20 = vpop.permute.xlu0 %128 }
 0x16b   :  { %v131_v21 = vmul.f32 %v218_v19, %v129_v20 }
 0x16d   :  { %133 = vrot.lane.b32.xlu0 %v131_v21, %s276_s0 }
 0x1df   :  { %v134_v22 = vpop.permute.xlu0 %133 }
 0x1e0   :  { %v136_v23 = vadd.f32 %v134_v22, %v118_v14 }
 0x1e2   :  { %219 = vtanh.f32 %v136_v23 }
 0x1ec   :  { %v220_v24 = vpop.eup %219 }
 0x1ed   :  { %140 = vrot.lane.b32.xlu1 %v220_v24, %s277_s3 }
 0x1f1   :  { %145 = vrot.lane.b32.xlu1 %v33_v25, %s275_s6 }
 0x25f   :  { %v141_v26 = vpop.permute.xlu1 %140 }
 0x260   :  { %v143_v29 = vmul.f32 %v141_v26, %v138_v27 }
 0x263   :  { %v146_v28 = vpop.permute.xlu1 %145 }
 0x264   :  { %v148_v30 = vmul.f32 %v218_v19, %v146_v28 }
 0x266   :  { %v149_v31 = vadd.f32 %v148_v30, %v143_v29 }
 0x268   :  { %151 = vrot.lane.b32.xlu0 %v149_v31, %s277_s3 }
 0x2da   :  { %v152_v32 = vpop.permute.xlu0 %151 }
 0x2db   :  { %155 = vst.msk [vmem:[#allocation5] sm:$0xff] %vm154_vm2, %v152_v32 }
 0x2dc   :  { %254 = shalt.err (!%p251_p12)
}
 0x2dd   :  { %s255_s13 = scalar_lea.hbm %s341_s4, 128 }
 0x2de   :  { %p256_p13 = scmp.ne.s32.totalorder %s341_s4, %s255_s13  ;;  %p259_p0 = scmp.lt.u32.totalorder %s255_s13, %s341_s4 }
 0x2e0   :  { %p261_p1 = pnand %p259_p0, %p256_p13 }
 0x2e2   :  { %264 = shalt.err (!%p261_p1)
}
 0x2e3   :  { %165 = dma.vmem_to_hbm [thread:$0]  %s163_s10, 128, %s341_s4, [#allocation4]  }
 0x2e4   :  { %267 = dma.done.wait [#allocation4], 128  }
 0x2e5   :  { %268 = vsyncadd [#allocation4], 4294967168 }
 0x2e6   :  { %169 = vsyncpa [#allocation3], 1 }
 0x2e7   :  { %170 = vsyncpa [#allocation4], 1 }

</bundles_post_ra>
